<compile_context>
chip_gen: v7x
topology: tpu7x:2x2x1
jax: 0.10.0
libtpu: 0.0.40
codegen_flags: <defaults>
</compile_context>

<pallas_src>
import jax
import jax.numpy as jnp
from jax.experimental import pallas as pl
from jax.experimental.pallas import tpu as pltpu


def _patch_embed_kernel(x_ref, w_ref, b_ref, o_ref):
    # x_ref: (1, tm, K) bf16 patch rows (flattened Hp*Wp positions of one image)
    # w_ref: (E, K)     bf16 projection weight, resident across the grid
    # b_ref: (E, 1)     f32  bias
    # o_ref: (1, E, tm) output tile (x.dtype), already in NCHW row order
    x = x_ref[0]                                   # (tm, K)
    w = w_ref[...]                                 # (E, K)
    # out[e, m] = sum_k w[e, k] * x[m, k]   ("A @ B.T" MXU pattern, f32 acc)
    acc = jax.lax.dot_general(
        w, x, (((1,), (1,)), ((), ())),
        preferred_element_type=jnp.float32)        # (E, tm)
    o_ref[0] = (acc + b_ref[...]).astype(o_ref.dtype)


def _pick_row_tile(n_rows, k, e, out_itemsize, *, batch, tm_max, vmem_budget):
    """Patch rows per grid step (= lane dim of the output tile)."""
    # Double-buffered per-row bytes: bf16 LHS row + output column.
    row_bytes = 2 * (k * 2 + e * out_itemsize)
    resident = 2 * (e * k * 2 + e * 4)             # weight + bias blocks
    fit = max((vmem_budget - resident) // max(row_bytes, 1), 8)
    tm = int(min(tm_max, fit))
    if tm >= n_rows:
        # Whole image in one tile (full-dim block: no 128-alignment needed).
        # With batch == 1 a single grid step would idle v7x's 2nd TensorCore,
        # so split in two when the halves stay lane-aligned.
        if batch == 1 and n_rows % 256 == 0:
            return n_rows // 2
        return n_rows
    # Interior tiles: the output block's lane dim must be a multiple of 128.
    return max(128, (tm // 128) * 128)


def patch_embed_forward(x, w_conv, b_conv, patch_size, *,
                        tm_max=1024, vmem_budget_bytes=12 * 1024 * 1024):
    """
    x:      [B, C, H, W]         (NCHW, like PyTorch)
    w_conv: [E, C, p, p]         (PyTorch Conv2d weight layout)
    b_conv: [E]
    returns [B, E, H//p, W//p]   (== Conv2d(kernel=stride=p, padding=0))
    """
    B, C, H, W = x.shape
    E = w_conv.shape[0]
    p = patch_size
    Hp, Wp = H // p, W // p
    n_rows = Hp * Wp
    K = C * p * p

    # --- glue: non-overlapping patch extraction (stride == kernel, pad 0) ---
    # Cast to bf16 first so the transpose materialises at most half the bytes;
    # allow_input_fusion below lets XLA fuse this chain into the kernel operand.
    # TODO(synk): fuse patch extraction into the kernel itself (NCHW BlockSpec
    # over (B, Hp) + in-VMEM rearrange) to remove this wrapper transpose pass.
    xb = x.astype(jnp.bfloat16)[:, :, :Hp * p, :Wp * p]
    xb = xb.reshape(B, C, Hp, p, Wp, p)
    patches = jnp.transpose(xb, (0, 2, 4, 1, 3, 5)).reshape(B, n_rows, K)

    # weight: [E, C, p, p] -> [E, K]; (c, dy, dx) flatten order matches patches.
    w2 = w_conv.reshape(E, K).astype(jnp.bfloat16)
    b2 = b_conv.astype(jnp.float32).reshape(E, 1)

    out_dtype = x.dtype
    out_itemsize = jnp.dtype(out_dtype).itemsize
    tm = _pick_row_tile(n_rows, K, E, out_itemsize, batch=B,
                        tm_max=tm_max, vmem_budget=vmem_budget_bytes)
    nt = pl.cdiv(n_rows, tm)

    cost = pl.CostEstimate(
        flops=2 * B * n_rows * K * E,
        transcendentals=0,
        bytes_accessed=(B * n_rows * K * 2 + E * K * 2 + E * 4
                        + B * n_rows * E * out_itemsize),
    )

    out = pl.pallas_call(
        _patch_embed_kernel,
        out_shape=jax.ShapeDtypeStruct((B, E, n_rows), out_dtype),
        grid_spec=pltpu.PrefetchScalarGridSpec(
            num_scalar_prefetch=0,
            grid=(B, nt),
            in_specs=[
                pl.BlockSpec((1, tm, K), lambda b, j: (b, j, 0)),
                # Resident weight/bias (constant index_map).  On v7x these
                # could be single-buffered via pipeline_mode=pl.Buffered(1)
                # to reclaim VMEM for a larger row tile.
                pl.BlockSpec((E, K), lambda b, j: (0, 0)),
                pl.BlockSpec((E, 1), lambda b, j: (0, 0)),
            ],
            out_specs=pl.BlockSpec((1, E, tm), lambda b, j: (b, 0, j)),
        ),
        compiler_params=pltpu.CompilerParams(
            dimension_semantics=("parallel", "parallel"),
            allow_input_fusion=[True, False, False],
        ),
        cost_estimate=cost,
    )(patches, w2, b2)

    # [B, E, Hp*Wp] -> [B, E, Hp, Wp]: contiguous reshape, no data movement.
    return out.reshape(B, E, Hp, Wp)
    # norm_layer=None -> nn.Identity(); nothing to do.


if __name__ == "__main__":
    # Small shapes consistent with the module's forward.
    B, C, H, W = 2, 4, 16, 16
    patch_size = 4          # patch_size == stride, padding = 0
    embed_dim = 32

    key = jax.random.PRNGKey(0)
    kx, kw, kb = jax.random.split(key, 3)
    x = jax.random.normal(kx, (B, C, H, W), dtype=jnp.float32)
    # Deterministic synthetic parameters in PyTorch Conv2d weight layout.
    w_conv = jax.random.normal(kw, (embed_dim, C, patch_size, patch_size),
                               dtype=jnp.float32) * 0.02
    b_conv = jax.random.normal(kb, (embed_dim,), dtype=jnp.float32) * 0.02

    fwd = jax.jit(patch_embed_forward, static_argnames=("patch_size",))
    out = fwd(x, w_conv, b_conv, patch_size=patch_size)
    out = jax.block_until_ready(out)

    # Reference: lax conv with the same semantics as nn.Conv2d (NCHW/OIHW).
    ref = jax.lax.conv_general_dilated(
        x, w_conv, window_strides=(patch_size, patch_size), padding="VALID",
        dimension_numbers=("NCHW", "OIHW", "NCHW"),
    ) + b_conv.reshape(1, embed_dim, 1, 1)

    assert out.shape == (B, embed_dim, H // patch_size, W // patch_size)
    assert out.dtype == x.dtype
    # Tolerance accounts for bf16 MXU operands (f32 accumulation) vs f32 ref.
    assert jnp.allclose(out, ref, atol=3e-2, rtol=3e-2)

    print("KERNEL_OK")
</pallas_src>

<mosaic_0001>
module attributes {stable_mosaic.version = 11 : i64} {
  func.func @_patch_embed_kernel(%arg0: i32, %arg1: i32, %arg2: memref<1x16x64xbf16, #tpu.memory_space<vmem>>, %arg3: memref<32x64xbf16, #tpu.memory_space<vmem>>, %arg4: memref<32x1xf32, #tpu.memory_space<vmem>>, %arg5: memref<1x32x16xf32, #tpu.memory_space<vmem>>) attributes {dimension_semantics = [#tpu.dimension_semantics<parallel>, #tpu.dimension_semantics<parallel>], iteration_bounds = array<i64: 2, 1>, scalar_prefetch = 0 : i64, scratch_operands = 0 : i64, tpu.core_type = #tpu.core_type<tc>, window_params = [{transform_indices = @transform_0, window_bounds = array<i64: 1, 16, 64>}, {pipeline_mode = #tpu.pipeline_mode<synchronous>, transform_indices = @transform_1, window_bounds = array<i64: 32, 64>}, {pipeline_mode = #tpu.pipeline_mode<synchronous>, transform_indices = @transform_2, window_bounds = array<i64: 32, 1>}, {transform_indices = @transform_3, window_bounds = array<i64: 1, 32, 16>}]} {
    %c0 = arith.constant 0 : index
    %c0_0 = arith.constant 0 : index
    %c0_1 = arith.constant 0 : index
    %0 = vector.load %arg2[%c0, %c0_0, %c0_1] : memref<1x16x64xbf16, #tpu.memory_space<vmem>>, vector<1x16x64xbf16>
    %1 = vector.shape_cast %0 : vector<1x16x64xbf16> to vector<16x64xbf16>
    %c0_2 = arith.constant 0 : index
    %c0_3 = arith.constant 0 : index
    %2 = vector.load %arg3[%c0_2, %c0_3] : memref<32x64xbf16, #tpu.memory_space<vmem>>, vector<32x64xbf16>
    %cst = arith.constant dense<0.000000e+00> : vector<32x16xf32>
    %3 = tpu.matmul %2, %1, %cst {dimension_numbers = #tpu.dot_dimension_numbers<[1], [1], [0], [0], [0, 0, 1, 0], [], []>} : vector<32x64xbf16>, vector<16x64xbf16>, vector<32x16xf32> -> vector<32x16xf32>
    %c0_4 = arith.constant 0 : index
    %c0_5 = arith.constant 0 : index
    %4 = vector.load %arg4[%c0_4, %c0_5] : memref<32x1xf32, #tpu.memory_space<vmem>>, vector<32x1xf32>
    %5 = vector.broadcast %4 : vector<32x1xf32> to vector<32x16xf32>
    %6 = arith.addf %3, %5 : vector<32x16xf32>
    %c0_6 = arith.constant 0 : index
    %c0_7 = arith.constant 0 : index
    %c0_8 = arith.constant 0 : index
    %7 = vector.load %arg5[%c0_6, %c0_7, %c0_8] : memref<1x32x16xf32, #tpu.memory_space<vmem>>, vector<1x32x16xf32>
    %8 = vector.shape_cast %7 : vector<1x32x16xf32> to vector<32x16xf32>
    %9 = vector.shape_cast %6 : vector<32x16xf32> to vector<1x32x16xf32>
    tpu.vector_store %arg5[%c0_6, %c0_7, %c0_8], %9 {strides = array<i32>} : memref<1x32x16xf32, #tpu.memory_space<vmem>>, vector<1x32x16xf32>,
    return
  }
  func.func @transform_0(%arg0: i32, %arg1: i32) -> (i32, i32, i32) {
    %c0_i32 = arith.constant 0 : i32
    %c0_i32_0 = arith.constant 0 : i32
    return %arg0, %arg1, %c0_i32 : i32, i32, i32
  }
  func.func @transform_1(%arg0: i32, %arg1: i32) -> (i32, i32) {
    %c0_i32 = arith.constant 0 : i32
    %c0_i32_0 = arith.constant 0 : i32
    %c0_i32_1 = arith.constant 0 : i32
    return %c0_i32, %c0_i32_0 : i32, i32
  }
  func.func @transform_2(%arg0: i32, %arg1: i32) -> (i32, i32) {
    %c0_i32 = arith.constant 0 : i32
    %c0_i32_0 = arith.constant 0 : i32
    %c0_i32_1 = arith.constant 0 : i32
    return %c0_i32, %c0_i32_0 : i32, i32
  }
  func.func @transform_3(%arg0: i32, %arg1: i32) -> (i32, i32, i32) {
    %c0_i32 = arith.constant 0 : i32
    %c0_i32_0 = arith.constant 0 : i32
    return %arg0, %c0_i32, %arg1 : i32, i32, i32
  }
}

</mosaic_0001>

<bundles_post_ra>
// kernel: patch_embed_forward.1
= control target key start
LH: loop header
LB: loop body
LE: loop exit
PB: predicated region body
PF: predicated region fallthrough
CT: control target
= control target key end

     0   :  { %s503_s12 = smov 0   ;;  %s505_s13 = smov 0   ;;  %s558_s0 = inlined_call_operand.vmem [shape: bf16[2,16,64], index: 0, kind: input, shape index: {}]   ;;  %s559_s1 = inlined_call_operand.vmem [shape: bf16[32,64], index: 1, kind: input, shape index: {}]   ;;  %s560_s2 = inlined_call_operand.vmem [shape: f32[32,1], index: 2, kind: input, shape index: {}]   ;;  %s561_s3 = inlined_call_operand.vmem [shape: f32[2,32,16], index: 3, kind: output, shape index: {}]  }
   0x1   :  { %s507_s14 = smov 0  }
   0x2 LB: > { %s25_s15 = sadd.s32 1, %s476_s13  ;;  %p404_p0 = scmp.ge.s32.totalorder %s480_s14, 1  ;;  %s480_s14 = sphi %s507_s14, %s13_s14   ;;  %s476_s13 = sphi %s505_s13, %s563_s13   ;;  %s472_s12 = sphi %s503_s12, %s562_s12  }
   0x3   : > { %p27_p1 = scmp.ge.s32.totalorder %s25_s15, 2  ;;  %p158_p2 = scmp.lt.s32.totalorder %s480_s14, 3 }
   0x5   : > { %s565_s15 = smov (%p27_p1, %s25_s15), 0  ;;  %p159_p3 = pnand %p404_p0, %p158_p2 }
   0x6   : > { %p190_p4 = scmp.lt.s32.totalorder (!%p159_p3), %s472_s12, 1  ;;  %v456_v0 = vld [vmem:[%s559_s1] sm:$0xff] (!%p159_p3)   ;;  %vm253_vm0 = vcmask (!%p159_p3), 523264   ;;  %v482_v1 = vmov (!%p159_p3), 0   ;;  %v216_v2 = vld [vmem:[%s560_s2 + $0x10] sm:$0xff] (!%p159_p3)  ;;  %v217_v4 = vld [vmem:[%s560_s2 + $0x18] sm:$0xff] (!%p159_p3) }
   0x7   : > { %162 = sbr.rel (%p159_p3) target bundleno = 244 (0xf4), region = 32  ;;  %454 = vset.pattern.permute.xlu1 (!%p159_p3), %v482_v1  ;;  %453 = vset.pattern.permute.xlu0 (!%p159_p3), %v482_v1  ;;  %v214_v3 = vld [vmem:[%s560_s2] sm:$0xff] (!%p159_p3)  ;;  %v215_v5 = vld [vmem:[%s560_s2 + $0x8] sm:$0xff] (!%p159_p3)  ;;  %vm312_vm1 = vcmask (!%p159_p3), 130048  }
   0x8   : > { %423 = vmatprep.mubr.msk.bf16.mxu0 (!%p159_p3), %vm253_vm0, %v456_v0  ;;  %230 = vperm.xlu1 (!%p159_p3), %454, %v216_v2   ;;  %v457_v8 = vld [vmem:[%s559_s1 + $0x8] sm:$0xff] (!%p159_p3)  }
   0x9   : > { %220 = vperm.xlu0 (!%p159_p3), %453, %v214_v3  }
   0xc   : > { %235 = vperm.xlu1 (!%p159_p3), %454, %v217_v4  }
   0xd   : > { %225 = vperm.xlu0 (!%p159_p3), %453, %v215_v5  }
   0xe   : > { %s567_s12 = smov (!%p190_p4, %s472_s12), 1 }
   0xf   : > { %s416_s22 = sshll.u32 %s567_s12, 3  ;;  %s417_s5 = sshll.u32 %s567_s12, 5 }
  0x10   : > { %s197_s27 = scalar_lea.vmem %s558_s0, %s416_s22  ;;  %s206_s8 = scalar_lea.vmem %s561_s3, %s417_s5 }
  0x11   : > { %v455_v6 = vld [vmem:[%s197_s27] sm:$0xff]  }
  0x12   : > { %427 = vmatprep.subr.msk.bf16.mxu0 %vm253_vm0, %v455_v6  ;;  %v261_v7 = vsel %vm253_vm0, %v455_v6, 0 }
  0x13   : > { %422 = vmatpush3.bf16.xpose.msra.mxu0 %v261_v7 }
  0x1a   : > { %424 = vmatmul.mubr.msk.bf16.vlgmr.msra.gmra.mrb[0].mxu0 %vm253_vm0, %v457_v8 }
  0x87   : > { %v231_v9 = vpop.permute.xlu1 %230 }
  0x88   : > { %v221_v10 = vpop.permute.xlu0 %220 }
  0x8b   : > { %v236_v14 = vpop.permute.xlu1 %235 }
  0x8c   : > { %v226_v17 = vpop.permute.xlu0 %225 }
  0xed   : > { %v425_v11 = vpop.f32.mrb[0].mxu0 }
  0xee   : > { %v306_v12 = vadd.f32 %v425_v11, %v231_v9  ;;  %v297_v13 = vpop.f32.mrb[1].mxu0 }
  0xef   : > { %v298_v15 = vadd.f32 %v297_v13, %v221_v10  ;;  %v426_v16 = vpop.f32.mrb[2].mxu0 }
  0xf0   : > { %315 = vst.msk [vmem:[%s206_s8 + $0x10] sm:$0xff] %vm312_vm1, %v306_v12  ;;  %v309_v18 = vadd.f32 %v426_v16, %v236_v14  ;;  %v300_v19 = vpop.f32.mrb[3].mxu0 }
  0xf1   : > { %313 = vst.msk [vmem:[%s206_s8] sm:$0xff] %vm312_vm1, %v298_v15  ;;  %v301_v20 = vadd.f32 %v300_v19, %v226_v17 }
  0xf2   : > { %316 = vst.msk [vmem:[%s206_s8 + $0x18] sm:$0xff] %vm312_vm1, %v309_v18 }
  0xf3   : > { %314 = vst.msk [vmem:[%s206_s8 + $0x8] sm:$0xff] %vm312_vm1, %v301_v20 }
  0xf4 PF: > { %s13_s14 = sadd.s32 1, %s480_s14   ;;  %s562_s12 = smov %s476_s13 }
  0xf5   : > { %p10_p5 = scmp.ge.s32.totalorder %s13_s14, 4   ;;  %s563_s13 = smov %s565_s15 }
  0xf7   :  { %12 = sbr.rel (!%p10_p5) target bundleno = 2 (0x2), region = 62 }

</bundles_post_ra>
